<compile_context>
chip_gen: v7x
topology: tpu7x:2x2x1
jax: 0.10.0
libtpu: 0.0.40
codegen_flags: <defaults>
</compile_context>

<pallas_src>
import functools
import math

import jax
import jax.numpy as jnp
from jax import lax
from jax.experimental import pallas as pl
from jax.experimental.pallas import tpu as pltpu

_MIB = 1024 * 1024


# --------------------------------------------------------------------------------------
# Helpers
# --------------------------------------------------------------------------------------
def _const_block_spec(shape, index_map, single_buffer):
    """BlockSpec for blocks whose index never changes (weights / biases).

    Single-buffering (pl.Buffered(1)) avoids wasting VMEM on double-buffering a block
    that is never re-fetched.
    """
    if single_buffer:
        return pl.BlockSpec(shape, index_map, pipeline_mode=pl.Buffered(1))
    return pl.BlockSpec(shape, index_map)


def _vmem_capacity_bytes():
    try:
        return int(pltpu.get_tpu_info().vmem_capacity_bytes)
    except Exception:
        return 64 * _MIB  # conservative (v7x per-core VMEM)


def _attn_vmem_estimate(S, H, NH, tq, return_weights, w_bytes, out_bytes):
    """Rough resident-set estimate (bytes) for the attention kernel at tile tq."""
    b = 2 * tq * H * 2              # q tile, bf16, double-buffered
    b += 2 * 2 * S * H * 2          # k and v, bf16, double-buffered (full S)
    b += 2 * (tq + S) * 4           # masks
    b += H * H * 2 + H * 4          # Wo + bo (single-buffered)
    b += 2 * tq * H * out_bytes     # output tile
    if return_weights:
        b += 2 * NH * tq * S * w_bytes  # probs tile
    b += tq * H * 4                 # ctx scratch (f32)
    b += 8 * tq * S * 4             # per-head f32 softmax temps (headroom)
    return b


# --------------------------------------------------------------------------------------
# Kernels
# --------------------------------------------------------------------------------------
def _qkv_proj_kernel(x_ref, wqkv_ref, bqkv_ref, q_ref, k_ref, v_ref):
    """Lane-dense fused QKV projection: one (Ts,H)@(H,3H) matmul per tile."""
    H = x_ref.shape[2]
    x = x_ref[0]                                                       # (Ts, H) bf16
    qkv = jnp.dot(x, wqkv_ref[...],
                  preferred_element_type=jnp.float32) + bqkv_ref[...]  # (Ts, 3H) f32
    # q already carries the 1/sqrt(head_dim) scale (folded into Wq/bq at pack time).
    q_ref[0] = qkv[:, :H].astype(q_ref.dtype)
    k_ref[0] = qkv[:, H:2 * H].astype(k_ref.dtype)
    v_ref[0] = qkv[:, 2 * H:].astype(v_ref.dtype)


def _split_attn_kernel(q_ref, k_ref, v_ref, mcol_ref, mrow_ref, wo_ref, bo_ref,
                       *rest, num_heads, return_weights):
    if return_weights:
        out_ref, probs_ref, ctx_ref = rest
    else:
        (out_ref, ctx_ref), probs_ref = rest, None

    S = k_ref.shape[1]
    H = k_ref.shape[2]
    hd = H // num_heads

    q = q_ref[0]                                                       # (Tq, H) bf16
    k = k_ref[0]                                                       # (S, H)  bf16
    v = v_ref[0]                                                       # (S, H)  bf16

    # attn_mask[i, j] = mask[i] & mask[j], as a boolean broadcast (no f32 (S,S) temp).
    is_fg = jnp.logical_and(mcol_ref[0] > 0.5, mrow_ref[0] > 0.5)      # (Tq, S) bool
    neg = jnp.float32(-1e30)

    # Static head loop; per-head temps die as soon as ctx/probs are stored.
    # (All elementwise / softmax math stays f32 -> VPU/EUP-safe on v5e; only MXU
    #  operands are bf16.)
    # TODO(synk): on v6e/v7x exp could run in bf16 for EUP throughput; kept f32 for
    #             v5e safety and weight accuracy.
    for h in range(num_heads):
        lo = h * hd
        q_h = q[:, lo:lo + hd]                                         # (Tq, hd) bf16
        k_h = k[:, lo:lo + hd]                                         # (S, hd)  bf16
        s_h = lax.dot_general(q_h, k_h, (((1,), (1,)), ((), ())),
                              preferred_element_type=jnp.float32)      # (Tq, S) f32

        # Split softmax with a PER-BRANCH row max (matches the reference's two
        # independent softmaxes) but a single exp: shift each position by its own
        # branch max. Masked -1e9 terms in the reference underflow to exactly 0, so
        # the branch denominators below are identical to the reference's.
        fg_max = jnp.max(jnp.where(is_fg, s_h, neg), axis=-1, keepdims=True)
        bg_max = jnp.max(jnp.where(is_fg, neg, s_h), axis=-1, keepdims=True)
        shift = jnp.where(is_fg, fg_max, bg_max)                       # (Tq, S)
        e = jnp.exp(s_h - shift)                                       # <= 1 everywhere
        fg_sum = jnp.sum(jnp.where(is_fg, e, 0.0), axis=-1, keepdims=True)
        bg_sum = jnp.sum(jnp.where(is_fg, 0.0, e), axis=-1, keepdims=True)
        # A branch with zero members gives sum==0 -> reciprocal inf, but jnp.where
        # never selects it for any position of that row, so no NaN can form.
        inv = jnp.where(is_fg,
                        pl.reciprocal(fg_sum, approx=True),
                        pl.reciprocal(bg_sum, approx=True))
        p_h = e * inv                                                  # (Tq, S) f32

        # TODO(synk): attention dropout is identity here (inference, p=0).
        if return_weights:
            probs_ref[0, h] = p_h.astype(probs_ref.dtype)

        # Head-packed, lane-dense context written straight into VMEM scratch.
        ctx_ref[:, lo:lo + hd] = jnp.dot(p_h.astype(v.dtype), v[:, lo:lo + hd],
                                         preferred_element_type=jnp.float32)

    # One full-depth out-projection over the packed (Tq, H) context.
    out = jnp.dot(ctx_ref[...].astype(wo_ref.dtype), wo_ref[...],
                  preferred_element_type=jnp.float32) + bo_ref[...]
    # TODO(synk): proj dropout is identity here (inference, p=0).
    out_ref[0] = out.astype(out_ref.dtype)


# --------------------------------------------------------------------------------------
# Packing + forward wrapper
# --------------------------------------------------------------------------------------
def pack_split_attention_params(params, num_heads, matmul_dtype=jnp.bfloat16):
    """One-time weight packing (hoisted out of the forward path)."""
    H = params["wq"].shape[0]
    hd = H // num_heads
    scale = 1.0 / math.sqrt(hd)
    wqkv = jnp.concatenate([params["wq"] * scale, params["wk"], params["wv"]], axis=1)
    bqkv = jnp.concatenate([params["bq"] * scale, params["bk"], params["bv"]], axis=0)
    return {
        "wqkv": wqkv.astype(matmul_dtype),                       # (H, 3H), Wq pre-scaled
        "bqkv": bqkv.astype(jnp.float32).reshape(1, 3 * H),      # f32 bias, bq pre-scaled
        "wo": params["wo"].astype(matmul_dtype),                 # (H, H)
        "bo": params["bo"].astype(jnp.float32).reshape(1, H),
    }


def split_attention_forward(x, mask, packed, num_heads, *, tq=None,
                            return_weights=True,
                            weights_dtype=jnp.bfloat16,
                            out_dtype=jnp.float32,
                            matmul_dtype=jnp.bfloat16,
                            single_buffer_weights=True):
    B, S, H = x.shape
    assert H % num_heads == 0

    w_bytes = jnp.dtype(weights_dtype).itemsize
    out_bytes = jnp.dtype(out_dtype).itemsize

    vmem_cap = _vmem_capacity_bytes()
    budget = int(0.7 * vmem_cap)

    if tq is None:
        tq = S if S <= 256 else 256
        while tq > 8 and (S % tq != 0 or
                          _attn_vmem_estimate(S, H, num_heads, tq, return_weights,
                                              w_bytes, out_bytes) > budget):
            tq //= 2
    # TODO(synk): sequences not divisible by the chosen tile are not padded.
    assert S % tq == 0, "query tile must divide sequence length"
    nq = S // tq

    x_c = x.astype(matmul_dtype)
    maskf = mask.astype(jnp.float32)
    mask_col = maskf.reshape(B, S, 1)
    mask_row = maskf.reshape(B, 1, S)

    def run(single_buffer):
        # ---- QKV projection (hoisted; computed once, not once per query tile) ----
        proj_est = (2 * tq * H * 2 + H * 3 * H * 2 + 3 * H * 4
                    + 3 * 2 * tq * H * 2 + 2 * tq * 3 * H * 4)
        proj_cost = pl.CostEstimate(
            flops=int(2 * B * S * H * 3 * H),
            transcendentals=0,
            bytes_accessed=int(B * S * H * 2 + H * 3 * H * 2 + 3 * H * 4
                               + 3 * B * S * H * 2))
        q, k, v = pl.pallas_call(
            _qkv_proj_kernel,
            grid_spec=pltpu.PrefetchScalarGridSpec(
                num_scalar_prefetch=0,
                grid=(B, nq),
                in_specs=[
                    pl.BlockSpec((1, tq, H), lambda b, si: (b, si, 0)),            # x tile
                    _const_block_spec((H, 3 * H), lambda b, si: (0, 0), single_buffer),
                    _const_block_spec((1, 3 * H), lambda b, si: (0, 0), single_buffer),
                ],
                out_specs=[
                    pl.BlockSpec((1, tq, H), lambda b, si: (b, si, 0)),
                    pl.BlockSpec((1, tq, H), lambda b, si: (b, si, 0)),
                    pl.BlockSpec((1, tq, H), lambda b, si: (b, si, 0)),
                ],
            ),
            out_shape=(jax.ShapeDtypeStruct((B, S, H), matmul_dtype),) * 3,
            compiler_params=pltpu.CompilerParams(
                dimension_semantics=("parallel", "parallel"),
                vmem_limit_bytes=int(min(max(2 * proj_est, 32 * _MIB),
                                         vmem_cap - 4 * _MIB))),
            cost_estimate=proj_cost,
        )(x_c, packed["wqkv"], packed["bqkv"])

        # ---- Fused split-softmax attention + out projection ----
        kernel = functools.partial(_split_attn_kernel,
                                   num_heads=num_heads,
                                   return_weights=return_weights)

        in_specs = [
            pl.BlockSpec((1, tq, H), lambda b, qi: (b, qi, 0)),    # q tile
            pl.BlockSpec((1, S, H), lambda b, qi: (b, 0, 0)),      # k (full S, resident)
            pl.BlockSpec((1, S, H), lambda b, qi: (b, 0, 0)),      # v (full S, resident)
            pl.BlockSpec((1, tq, 1), lambda b, qi: (b, qi, 0)),    # mask (query rows)
            pl.BlockSpec((1, 1, S), lambda b, qi: (b, 0, 0)),      # mask (key cols)
            _const_block_spec((H, H), lambda b, qi: (0, 0), single_buffer),   # Wo
            _const_block_spec((1, H), lambda b, qi: (0, 0), single_buffer),   # bo
        ]
        out_specs = [pl.BlockSpec((1, tq, H), lambda b, qi: (b, qi, 0))]
        out_shapes = [jax.ShapeDtypeStruct((B, S, H), out_dtype)]
        if return_weights:
            out_specs.append(
                pl.BlockSpec((1, num_heads, tq, S), lambda b, qi: (b, 0, qi, 0)))
            out_shapes.append(
                jax.ShapeDtypeStruct((B, num_heads, S, S), weights_dtype))

        attn_bytes = (B * 3 * S * H * 2 + B * 2 * S * 4 + H * H * 2 + H * 4
                      + B * S * H * out_bytes)
        if return_weights:
            attn_bytes += B * num_heads * S * S * w_bytes
        attn_cost = pl.CostEstimate(
            flops=int(B * (4 * S * S * H + 2 * S * H * H)),
            transcendentals=int(B * num_heads * S * S),
            bytes_accessed=int(attn_bytes))

        est = _attn_vmem_estimate(S, H, num_heads, tq, return_weights, w_bytes, out_bytes)
        result = pl.pallas_call(
            kernel,
            grid_spec=pltpu.PrefetchScalarGridSpec(
                num_scalar_prefetch=0,
                grid=(B, nq),
                in_specs=in_specs,
                out_specs=out_specs,
                scratch_shapes=[pltpu.VMEM((tq, H), jnp.float32)],   # head-packed ctx
            ),
            out_shape=tuple(out_shapes),
            compiler_params=pltpu.CompilerParams(
                dimension_semantics=("parallel", "parallel"),
                vmem_limit_bytes=int(min(max(2 * est, 32 * _MIB), vmem_cap - 4 * _MIB))),
            cost_estimate=attn_cost,
        )(q, k, v, mask_col, mask_row, packed["wo"], packed["bo"])

        if return_weights:
            return result[0], result[1]
        return result[0], None

    if single_buffer_weights:
        try:
            return run(True)
        except Exception:
            # TODO(synk): pl.Buffered(1) (single-buffered constant weights) unsupported
            # on this jax/backend; fall back to default double-buffering.
            pass
    return run(False)


# --------------------------------------------------------------------------------------
# Reference + test
# --------------------------------------------------------------------------------------
def reference_forward(x, mask, params, num_heads):
    """Pure-JAX f32 mirror of the PyTorch SplitAttention forward."""
    B, S, H = x.shape
    hd = H // num_heads

    def split(t):
        return t.reshape(B, S, num_heads, hd).transpose(0, 2, 1, 3)

    q = split(x @ params["wq"] + params["bq"])
    k = split(x @ params["wk"] + params["bk"])
    v = split(x @ params["wv"] + params["bv"])
    scores = jnp.einsum("bhqd,bhkd->bhqk", q, k) / math.sqrt(hd)
    m = mask.astype(jnp.float32)
    pair = m[:, None, :, None] * m[:, None, None, :]          # (B,1,S,S)
    fg = jnp.where(pair == 0, -1e9, scores)
    bg = jnp.where(pair == 1, -1e9, scores)
    fgp = jax.nn.softmax(fg, axis=-1)
    bgp = jax.nn.softmax(bg, axis=-1)
    probs = jnp.where(pair == 1, fgp, bgp)                    # (B,nh,S,S)
    ctx = jnp.einsum("bhqk,bhkd->bhqd", probs, v)
    ctx = ctx.transpose(0, 2, 1, 3).reshape(B, S, H)
    return ctx @ params["wo"] + params["bo"], probs


if __name__ == "__main__":
    B, S, H, NH = 2, 8, 32, 4   # batch, seq, hidden_size, num_heads (head_dim = 8)

    key = jax.random.PRNGKey(0)
    ks = jax.random.split(key, 12)
    x = jax.random.normal(ks[0], (B, S, H), dtype=jnp.float32)
    mask = (jax.random.uniform(ks[1], (B, S)) > 0.5).astype(jnp.int32)

    params = {
        "wq": 0.1 * jax.random.normal(ks[2], (H, H), dtype=jnp.float32),
        "bq": 0.1 * jax.random.normal(ks[3], (H,), dtype=jnp.float32),
        "wk": 0.1 * jax.random.normal(ks[4], (H, H), dtype=jnp.float32),
        "bk": 0.1 * jax.random.normal(ks[5], (H,), dtype=jnp.float32),
        "wv": 0.1 * jax.random.normal(ks[6], (H, H), dtype=jnp.float32),
        "bv": 0.1 * jax.random.normal(ks[7], (H,), dtype=jnp.float32),
        "wo": 0.1 * jax.random.normal(ks[8], (H, H), dtype=jnp.float32),
        "bo": 0.1 * jax.random.normal(ks[9], (H,), dtype=jnp.float32),
    }

    packed = pack_split_attention_params(params, NH)
    out, weights = split_attention_forward(x, mask, packed, NH, return_weights=True)
    jax.block_until_ready(out)
    jax.block_until_ready(weights)

    ref_out, ref_weights = reference_forward(x, mask, params, NH)
    # Tolerances account for bf16 MXU operands (x, weights, q/k/probs/V), bf16
    # attention-weights output and the approx reciprocal.
    assert jnp.allclose(out, ref_out, atol=4e-2, rtol=4e-2), "output mismatch"
    assert jnp.allclose(weights.astype(jnp.float32), ref_weights,
                        atol=3e-2, rtol=5e-2), "weights mismatch"

    print("KERNEL_OK")
</pallas_src>

<mosaic_0001>
module attributes {stable_mosaic.version = 11 : i64} {
  func.func @_qkv_proj_kernel(%arg0: i32, %arg1: i32, %arg2: memref<1x8x32xbf16, #tpu.memory_space<vmem>>, %arg3: memref<32x96xbf16, #tpu.memory_space<vmem>>, %arg4: memref<1x96xf32, #tpu.memory_space<vmem>>, %arg5: memref<1x8x32xbf16, #tpu.memory_space<vmem>>, %arg6: memref<1x8x32xbf16, #tpu.memory_space<vmem>>, %arg7: memref<1x8x32xbf16, #tpu.memory_space<vmem>>) attributes {dimension_semantics = [#tpu.dimension_semantics<parallel>, #tpu.dimension_semantics<parallel>], iteration_bounds = array<i64: 2, 1>, scalar_prefetch = 0 : i64, scratch_operands = 0 : i64, tpu.core_type = #tpu.core_type<tc>, window_params = [{transform_indices = @transform_0, window_bounds = array<i64: 1, 8, 32>}, {pipeline_mode = #tpu.pipeline_mode<synchronous>, transform_indices = @transform_1, window_bounds = array<i64: 32, 96>}, {pipeline_mode = #tpu.pipeline_mode<synchronous>, transform_indices = @transform_2, window_bounds = array<i64: 1, 96>}, {transform_indices = @transform_3, window_bounds = array<i64: 1, 8, 32>}, {transform_indices = @transform_4, window_bounds = array<i64: 1, 8, 32>}, {transform_indices = @transform_5, window_bounds = array<i64: 1, 8, 32>}]} {
    %c0 = arith.constant 0 : index
    %c0_0 = arith.constant 0 : index
    %c0_1 = arith.constant 0 : index
    %0 = vector.load %arg2[%c0, %c0_0, %c0_1] : memref<1x8x32xbf16, #tpu.memory_space<vmem>>, vector<1x8x32xbf16>
    %1 = vector.shape_cast %0 : vector<1x8x32xbf16> to vector<8x32xbf16>
    %c0_2 = arith.constant 0 : index
    %c0_3 = arith.constant 0 : index
    %2 = vector.load %arg3[%c0_2, %c0_3] : memref<32x96xbf16, #tpu.memory_space<vmem>>, vector<32x96xbf16>
    %cst = arith.constant dense<0.000000e+00> : vector<8x96xf32>
    %3 = tpu.matmul %1, %2, %cst {dimension_numbers = #tpu.dot_dimension_numbers<[1], [0], [0], [1], [0, 0, 1, 1], [], []>} : vector<8x32xbf16>, vector<32x96xbf16>, vector<8x96xf32> -> vector<8x96xf32>
    %c0_4 = arith.constant 0 : index
    %c0_5 = arith.constant 0 : index
    %4 = vector.load %arg4[%c0_4, %c0_5] : memref<1x96xf32, #tpu.memory_space<vmem>>, vector<1x96xf32>
    %5 = vector.broadcast %4 : vector<1x96xf32> to vector<8x96xf32>
    %6 = arith.addf %3, %5 : vector<8x96xf32>
    %7 = vector.extract_strided_slice %6 {offsets = [0, 0], sizes = [8, 32], strides = [1, 1]} : vector<8x96xf32> to vector<8x32xf32>
    %8 = arith.truncf %7 : vector<8x32xf32> to vector<8x32xbf16>
    %c0_6 = arith.constant 0 : index
    %c0_7 = arith.constant 0 : index
    %c0_8 = arith.constant 0 : index
    %9 = vector.load %arg5[%c0_6, %c0_7, %c0_8] : memref<1x8x32xbf16, #tpu.memory_space<vmem>>, vector<1x8x32xbf16>
    %10 = vector.shape_cast %9 : vector<1x8x32xbf16> to vector<8x32xbf16>
    %11 = vector.shape_cast %8 : vector<8x32xbf16> to vector<1x8x32xbf16>
    tpu.vector_store %arg5[%c0_6, %c0_7, %c0_8], %11 {strides = array<i32>} : memref<1x8x32xbf16, #tpu.memory_space<vmem>>, vector<1x8x32xbf16>,
    %12 = vector.extract_strided_slice %6 {offsets = [0, 32], sizes = [8, 32], strides = [1, 1]} : vector<8x96xf32> to vector<8x32xf32>
    %13 = arith.truncf %12 : vector<8x32xf32> to vector<8x32xbf16>
    %c0_9 = arith.constant 0 : index
    %c0_10 = arith.constant 0 : index
    %c0_11 = arith.constant 0 : index
    %14 = vector.load %arg6[%c0_9, %c0_10, %c0_11] : memref<1x8x32xbf16, #tpu.memory_space<vmem>>, vector<1x8x32xbf16>
    %15 = vector.shape_cast %14 : vector<1x8x32xbf16> to vector<8x32xbf16>
    %16 = vector.shape_cast %13 : vector<8x32xbf16> to vector<1x8x32xbf16>
    tpu.vector_store %arg6[%c0_9, %c0_10, %c0_11], %16 {strides = array<i32>} : memref<1x8x32xbf16, #tpu.memory_space<vmem>>, vector<1x8x32xbf16>,
    %17 = vector.extract_strided_slice %6 {offsets = [0, 64], sizes = [8, 32], strides = [1, 1]} : vector<8x96xf32> to vector<8x32xf32>
    %18 = arith.truncf %17 : vector<8x32xf32> to vector<8x32xbf16>
    %c0_12 = arith.constant 0 : index
    %c0_13 = arith.constant 0 : index
    %c0_14 = arith.constant 0 : index
    %19 = vector.load %arg7[%c0_12, %c0_13, %c0_14] : memref<1x8x32xbf16, #tpu.memory_space<vmem>>, vector<1x8x32xbf16>
    %20 = vector.shape_cast %19 : vector<1x8x32xbf16> to vector<8x32xbf16>
    %21 = vector.shape_cast %18 : vector<8x32xbf16> to vector<1x8x32xbf16>
    tpu.vector_store %arg7[%c0_12, %c0_13, %c0_14], %21 {strides = array<i32>} : memref<1x8x32xbf16, #tpu.memory_space<vmem>>, vector<1x8x32xbf16>,
    return
  }
  func.func @transform_0(%arg0: i32, %arg1: i32) -> (i32, i32, i32) {
    %c0_i32 = arith.constant 0 : i32
    %c0_i32_0 = arith.constant 0 : i32
    return %arg0, %arg1, %c0_i32 : i32, i32, i32
  }
  func.func @transform_1(%arg0: i32, %arg1: i32) -> (i32, i32) {
    %c0_i32 = arith.constant 0 : i32
    %c0_i32_0 = arith.constant 0 : i32
    %c0_i32_1 = arith.constant 0 : i32
    return %c0_i32, %c0_i32_0 : i32, i32
  }
  func.func @transform_2(%arg0: i32, %arg1: i32) -> (i32, i32) {
    %c0_i32 = arith.constant 0 : i32
    %c0_i32_0 = arith.constant 0 : i32
    %c0_i32_1 = arith.constant 0 : i32
    return %c0_i32, %c0_i32_0 : i32, i32
  }
  func.func @transform_3(%arg0: i32, %arg1: i32) -> (i32, i32, i32) {
    %c0_i32 = arith.constant 0 : i32
    %c0_i32_0 = arith.constant 0 : i32
    return %arg0, %arg1, %c0_i32 : i32, i32, i32
  }
  func.func @transform_4(%arg0: i32, %arg1: i32) -> (i32, i32, i32) {
    %c0_i32 = arith.constant 0 : i32
    %c0_i32_0 = arith.constant 0 : i32
    return %arg0, %arg1, %c0_i32 : i32, i32, i32
  }
  func.func @transform_5(%arg0: i32, %arg1: i32) -> (i32, i32, i32) {
    %c0_i32 = arith.constant 0 : i32
    %c0_i32_0 = arith.constant 0 : i32
    return %arg0, %arg1, %c0_i32 : i32, i32, i32
  }
}

module attributes {stable_mosaic.version = 11 : i64} {
  func.func @_qkv_proj_kernel(%arg0: i32, %arg1: i32, %arg2: memref<1x8x32xbf16, #tpu.memory_space<vmem>>, %arg3: memref<32x96xbf16, #tpu.memory_space<vmem>>, %arg4: memref<1x96xf32, #tpu.memory_space<vmem>>, %arg5: memref<1x8x32xbf16, #tpu.memory_space<vmem>>, %arg6: memref<1x8x32xbf16, #tpu.memory_space<vmem>>, %arg7: memref<1x8x32xbf16, #tpu.memory_space<vmem>>) attributes {dimension_semantics = [#tpu.dimension_semantics<parallel>, #tpu.dimension_semantics<parallel>], iteration_bounds = array<i64: 2, 1>, scalar_prefetch = 0 : i64, scratch_operands = 0 : i64, tpu.core_type = #tpu.core_type<tc>, window_params = [{transform_indices = @transform_0, window_bounds = array<i64: 1, 8, 32>}, {pipeline_mode = #tpu.pipeline_mode<synchronous>, transform_indices = @transform_1, window_bounds = array<i64: 32, 96>}, {pipeline_mode = #tpu.pipeline_mode<synchronous>, transform_indices = @transform_2, window_bounds = array<i64: 1, 96>}, {transform_indices = @transform_3, window_bounds = array<i64: 1, 8, 32>}, {transform_indices = @transform_4, window_bounds = array<i64: 1, 8, 32>}, {transform_indices = @transform_5, window_bounds = array<i64: 1, 8, 32>}]} {
    %c0 = arith.constant 0 : index
    %c0_0 = arith.constant 0 : index
    %c0_1 = arith.constant 0 : index
    %0 = vector.load %arg2[%c0, %c0_0, %c0_1] : memref<1x8x32xbf16, #tpu.memory_space<vmem>>, vector<1x8x32xbf16>
    %1 = vector.shape_cast %0 : vector<1x8x32xbf16> to vector<8x32xbf16>
    %c0_2 = arith.constant 0 : index
    %c0_3 = arith.constant 0 : index
    %2 = vector.load %arg3[%c0_2, %c0_3] : memref<32x96xbf16, #tpu.memory_space<vmem>>, vector<32x96xbf16>
    %cst = arith.constant dense<0.000000e+00> : vector<8x96xf32>
    %3 = tpu.matmul %1, %2, %cst {dimension_numbers = #tpu.dot_dimension_numbers<[1], [0], [0], [1], [0, 0, 1, 1], [], []>} : vector<8x32xbf16>, vector<32x96xbf16>, vector<8x96xf32> -> vector<8x96xf32>
    %c0_4 = arith.constant 0 : index
    %c0_5 = arith.constant 0 : index
    %4 = vector.load %arg4[%c0_4, %c0_5] : memref<1x96xf32, #tpu.memory_space<vmem>>, vector<1x96xf32>
    %5 = vector.broadcast %4 : vector<1x96xf32> to vector<8x96xf32>
    %6 = arith.addf %3, %5 : vector<8x96xf32>
    %7 = vector.extract_strided_slice %6 {offsets = [0, 0], sizes = [8, 32], strides = [1, 1]} : vector<8x96xf32> to vector<8x32xf32>
    %8 = arith.truncf %7 : vector<8x32xf32> to vector<8x32xbf16>
    %c0_6 = arith.constant 0 : index
    %c0_7 = arith.constant 0 : index
    %c0_8 = arith.constant 0 : index
    %9 = vector.load %arg5[%c0_6, %c0_7, %c0_8] : memref<1x8x32xbf16, #tpu.memory_space<vmem>>, vector<1x8x32xbf16>
    %10 = vector.shape_cast %9 : vector<1x8x32xbf16> to vector<8x32xbf16>
    %11 = vector.shape_cast %8 : vector<8x32xbf16> to vector<1x8x32xbf16>
    tpu.vector_store %arg5[%c0_6, %c0_7, %c0_8], %11 {strides = array<i32>} : memref<1x8x32xbf16, #tpu.memory_space<vmem>>, vector<1x8x32xbf16>,
    %12 = vector.extract_strided_slice %6 {offsets = [0, 32], sizes = [8, 32], strides = [1, 1]} : vector<8x96xf32> to vector<8x32xf32>
    %13 = arith.truncf %12 : vector<8x32xf32> to vector<8x32xbf16>
    %c0_9 = arith.constant 0 : index
    %c0_10 = arith.constant 0 : index
    %c0_11 = arith.constant 0 : index
    %14 = vector.load %arg6[%c0_9, %c0_10, %c0_11] : memref<1x8x32xbf16, #tpu.memory_space<vmem>>, vector<1x8x32xbf16>
    %15 = vector.shape_cast %14 : vector<1x8x32xbf16> to vector<8x32xbf16>
    %16 = vector.shape_cast %13 : vector<8x32xbf16> to vector<1x8x32xbf16>
    tpu.vector_store %arg6[%c0_9, %c0_10, %c0_11], %16 {strides = array<i32>} : memref<1x8x32xbf16, #tpu.memory_space<vmem>>, vector<1x8x32xbf16>,
    %17 = vector.extract_strided_slice %6 {offsets = [0, 64], sizes = [8, 32], strides = [1, 1]} : vector<8x96xf32> to vector<8x32xf32>
    %18 = arith.truncf %17 : vector<8x32xf32> to vector<8x32xbf16>
    %c0_12 = arith.constant 0 : index
    %c0_13 = arith.constant 0 : index
    %c0_14 = arith.constant 0 : index
    %19 = vector.load %arg7[%c0_12, %c0_13, %c0_14] : memref<1x8x32xbf16, #tpu.memory_space<vmem>>, vector<1x8x32xbf16>
    %20 = vector.shape_cast %19 : vector<1x8x32xbf16> to vector<8x32xbf16>
    %21 = vector.shape_cast %18 : vector<8x32xbf16> to vector<1x8x32xbf16>
    tpu.vector_store %arg7[%c0_12, %c0_13, %c0_14], %21 {strides = array<i32>} : memref<1x8x32xbf16, #tpu.memory_space<vmem>>, vector<1x8x32xbf16>,
    return
  }
  func.func @transform_0(%arg0: i32, %arg1: i32) -> (i32, i32, i32) {
    %c0_i32 = arith.constant 0 : i32
    %c0_i32_0 = arith.constant 0 : i32
    return %arg0, %arg1, %c0_i32 : i32, i32, i32
  }
  func.func @transform_1(%arg0: i32, %arg1: i32) -> (i32, i32) {
    %c0_i32 = arith.constant 0 : i32
    %c0_i32_0 = arith.constant 0 : i32
    %c0_i32_1 = arith.constant 0 : i32
    return %c0_i32, %c0_i32_0 : i32, i32
  }
  func.func @transform_2(%arg0: i32, %arg1: i32) -> (i32, i32) {
    %c0_i32 = arith.constant 0 : i32
    %c0_i32_0 = arith.constant 0 : i32
    %c0_i32_1 = arith.constant 0 : i32
    return %c0_i32, %c0_i32_0 : i32, i32
  }
  func.func @transform_3(%arg0: i32, %arg1: i32) -> (i32, i32, i32) {
    %c0_i32 = arith.constant 0 : i32
    %c0_i32_0 = arith.constant 0 : i32
    return %arg0, %arg1, %c0_i32 : i32, i32, i32
  }
  func.func @transform_4(%arg0: i32, %arg1: i32) -> (i32, i32, i32) {
    %c0_i32 = arith.constant 0 : i32
    %c0_i32_0 = arith.constant 0 : i32
    return %arg0, %arg1, %c0_i32 : i32, i32, i32
  }
  func.func @transform_5(%arg0: i32, %arg1: i32) -> (i32, i32, i32) {
    %c0_i32 = arith.constant 0 : i32
    %c0_i32_0 = arith.constant 0 : i32
    return %arg0, %arg1, %c0_i32 : i32, i32, i32
  }
}

</mosaic_0001>

<bundles_post_ra>
// kernel: tpu_custom_call.1
= control target key start
LH: loop header
LB: loop body
LE: loop exit
PB: predicated region body
PF: predicated region fallthrough
CT: control target
= control target key end

     0   :  { %11 = vsyncpa [#allocation3], 0  ;;  %s1258_s0 = inlined_call_operand.hbm [shape: bf16[2,8,32], index: 0, kind: input, shape index: {}]   ;;  %s1259_s1 = inlined_call_operand.hbm [shape: bf16[32,96], index: 1, kind: input, shape index: {}]   ;;  %s1260_s2 = inlined_call_operand.vmem [shape: f32[1,96], index: 2, kind: input, shape index: {}]   ;;  %s1261_s3 = inlined_call_operand.hbm [shape: bf16[2,8,32], index: 3, kind: output, shape index: {0}]   ;;  %s1262_s4 = inlined_call_operand.hbm [shape: bf16[2,8,32], index: 4, kind: output, shape index: {1}]   ;;  %s1263_s5 = inlined_call_operand.hbm [shape: bf16[2,8,32], index: 5, kind: output, shape index: {2}]  }
   0x1   :  { %13 = vsyncpa [#allocation3 + $0x1], 0 }
   0x2   :  { %14 = vsyncpa [#allocation6], 0 }
   0x3   :  { %15 = vsyncpa [#allocation4], 0 }
   0x4   :  { %17 = vsyncpa [#allocation4 + $0x1], 0 }
   0x5   :  { %18 = vsyncpa [#allocation9], 0 }
   0x6   :  { %20 = vsyncpa [#allocation9 + $0x1], 0  ;;  %s959_s18 = smov 0   ;;  %s961_s19 = smov 0  }
   0x7   :  { %s963_s20 = smov 0   ;;  %s965_s21 = smov 0  }
   0x8   :  { %s967_s22 = smov 0   ;;  %s969_s23 = smov 0  }
   0x9 LB: > { %s990_s24 = sadd.s32 4294967295, %s916_s23   ;;  %s1267_s25 = sadd.s32 4294967294, %s916_s23   ;;  %s916_s23 = sphi %s969_s23, %s26_s23   ;;  %s912_s22 = sphi %s967_s22, %s1287_s22   ;;  %s908_s21 = sphi %s965_s21, %s1286_s21   ;;  %s904_s20 = sphi %s963_s20, %s1285_s20   ;;  %s900_s19 = sphi %s961_s19, %s1284_s19   ;;  %s896_s18 = sphi %s959_s18, %s1283_s18  }
   0xa   : > { %p60_p0 = scmp.ne.s32.totalorder %s900_s19, %s896_s18  ;;  %p1264_p1 = scmp.eq.s32.totalorder %s990_s24, 0 }
   0xb   : > { %p134_p3 = scmp.eq.s32.totalorder %s1267_s25, 1  ;;  %p585_p5 = scmp.ge.s32.totalorder %s916_s23, 1 }
   0xc   : > { %p1001_p4 = por %p1264_p1, %p60_p0  ;;  %p197_p7 = scmp.lt.s32.totalorder %s916_s23, 3 }
   0xd   : > { %p1006_p6 = por %p134_p3, %p60_p0  ;;  %s918_s29 = smov [#allocation5]  }
   0xe   : > { %s1268_s26 = scalar_select %p1001_p4, 1, 0 }
   0xf   : > { %s1269_s27 = scalar_select %p1006_p6, 1, 0 }
  0x10   : > { %p1011_p8 = pnand %p585_p5, %p197_p7  ;;  %s209_s30 = sshll.u32 %s918_s29, 4  ;;  %s210_s30 = int_to_ptr.vmem [resolvable:$true] %s209_s30 }
  0x11   : > { %s38_s7 = sadd.s32 1, %s912_s22  ;;  %s712_s10 = scalar_lea.hbm %s1259_s1, 256 }
  0x12   : > { %s1270_s28 = scalar_select %p1011_p8, 1, 0 }
  0x13   : > { %p633_p9 = pneg %p1011_p8  ;;  %p713_p12 = scmp.ne.s32.totalorder %s1259_s1, %s712_s10 }
  0x14   : > { %p719_p5 = scmp.lt.u32.totalorder %s712_s10, %s1259_s1 }
  0x15   : > { %p1020_p11 = pnand %p633_p9, %p1264_p1 }
  0x17   : > { %p714_p13 = pneg %p1020_p11 }
  0x19   : > { %p715_p0 = pnand %p714_p13, %p713_p12 }
  0x1b   : > { %p716_p3 = pneg %p715_p0 }
  0x1d   : > { %p721_p7 = pnand %p719_p5, %p716_p3 }
  0x1f   : > { %724 = shalt.err (!%p721_p7)
}
  0x20   : > { %s725_s15 = scalar_lea.vmem %s210_s30, 256  ;;  %p733_p2 = scmp.lt.s32.totalorder %s210_s30, %s210_s30 }
  0x21   : > { %p726_p9 = scmp.ne.s32.totalorder %s210_s30, %s725_s15  ;;  %p734_p6 = scmp.lt.s32.totalorder %s725_s15, %s725_s15 }
  0x23   : > { %p728_p10 = pnand %p726_p9, %p714_p13  ;;  %p735_p4 = por %p734_p6, %p733_p2 }
  0x25   : > { %p729_p1 = pneg %p728_p10 }
  0x27   : > { %p736_p8 = pnand %p735_p4, %p729_p1 }
  0x29   : > { %739 = shalt.err (!%p736_p8)
}
  0x2a   : > { %s919_s16 = smov 64   ;;  %s920_s17 = smov 4  }
  0x2b   : > { %636 = dma.hbm_to_vmem [thread:$0]  (!%p1020_p11), %s1259_s1, 256, %s210_s30, [#allocation6], %s919_s16, %s919_s16, %s920_s17  }
  0x2c   : > { %p40_p1 = scmp.ge.s32.totalorder %s38_s7, 2  ;;  %s47_s9 = sadd.s32 1, %s904_s20 }
  0x2d   : > { %p54_p2 = scmp.ne.s32.totalorder %s904_s20, %s900_s19  ;;  %p55_p4 = scmp.eq.s32.totalorder %s916_s23, 0 }
  0x2e   : > { %s1289_s7 = smov (%p40_p1, %s38_s7), 0  ;;  %p1273_p8 = scmp.eq.s32.totalorder %s990_s24, 1 }
  0x2f   : > { %p1047_p6 = por %p55_p4, %p54_p2  ;;  %s42_s6 = ssub.s32 %s912_s22, %s1289_s7 }
  0x30   : > { %p1053_p10 = por %p1273_p8, %p54_p2  ;;  %p652_p12 = scmp.lt.s32.totalorder %s916_s23, 2 }
  0x31   : > { %p45_p11 = scmp.eq.s32.totalorder %s42_s6, 0  ;;  %s226_s30 = sand.u32 1, %s904_s20  }
  0x32   : > { %s588_s12 = sshll.u32 %s226_s30, 2  ;;  %s589_s14 = sshll.u32 %s912_s22, 6 }
  0x33   : > { %s1062_s13 = scalar_select %p45_p11, %s904_s20, %s47_s9  }
  0x34   : > { %s1068_s17 = scalar_lea.hbm %s1258_s0, %s589_s14  ;;  %s230_s29 = scalar_lea.vmem [#allocation2], %s588_s12 }
  0x35   : > { %s238_s8 = sshll.u32 %s230_s29, 4  ;;  %p1074_p13 = pnand %p652_p12, %p1047_p6  ;;  %s1070_s8 = int_to_ptr.vmem [resolvable:$true] %s238_s8 }
  0x36   : > { %s227_s9 = scalar_lea.sflag [#allocation3], %s226_s30  ;;  %s740_s25 = scalar_lea.hbm %s1068_s17, 64 }
  0x37   : > { %p741_p0 = scmp.ne.s32.totalorder %s1068_s17, %s740_s25  ;;  %p742_p3 = pneg %p1074_p13 }
  0x38   : > { %s745_s15 = scalar_lea.hbm %s1258_s0, 128  ;;  %p746_p9 = scmp.lt.u32.totalorder %s1068_s17, %s1258_s0 }
  0x39   : > { %p743_p5 = pnand %p742_p3, %p741_p0  ;;  %p747_p1 = scmp.lt.u32.totalorder %s745_s15, %s740_s25 }
  0x3a   : > { %p749_p4 = scmp.lt.u32.totalorder %s740_s25, %s1068_s17 }
  0x3b   : > { %p744_p7 = pneg %p743_p5  ;;  %p748_p2 = por %p747_p1, %p746_p9 }
  0x3d   : > { %p750_p6 = por %p749_p4, %p748_p2 }
  0x3f   : > { %p751_p8 = pnand %p750_p6, %p744_p7 }
  0x41   : > { %754 = shalt.err (!%p751_p8)
}
  0x42   : > { %s755_s30 = scalar_lea.vmem %s1070_s8, 64  ;;  %s921_s29 = smov [#allocation2]  }
  0x43   : > { %p756_p12 = scmp.ne.s32.totalorder %s1070_s8, %s755_s30  ;;  %s760_s12 = sshll.u32 %s921_s29, 4  ;;  %s761_s12 = int_to_ptr.vmem [resolvable:$false] %s760_s12 }
  0x44   : > { %s762_s14 = scalar_lea.vmem %s761_s12, 128  ;;  %p763_p5 = scmp.lt.s32.totalorder %s1070_s8, %s761_s12 }
  0x45   : > { %p758_p11 = pnand %p756_p12, %p742_p3  ;;  %p764_p9 = scmp.lt.s32.totalorder %s762_s14, %s755_s30 }
  0x47   : > { %p759_p0 = pneg %p758_p11  ;;  %p765_p1 = por %p764_p9, %p763_p5 }
  0x49   : > { %p766_p2 = pnand %p765_p1, %p759_p0 }
  0x4b   : > { %769 = shalt.err (!%p766_p2)
}
  0x4c   : > { %640 = dma.hbm_to_vmem [thread:$0]  (!%p1074_p13), %s1068_s17, 64, %s1070_s8, %s227_s9  }
  0x4d   : > { %p1276_p7 = scmp.ne.s32.totalorder %s1270_s28, 0 }
  0x4e   : > { %s1106_s25 = sand.u32 (!%p1276_p7), 1, %s900_s19   ;;  %p1277_p3 = scmp.ne.s32.totalorder (!%p1276_p7), %s1268_s26, 0 }
  0x4f   : > { %247 = sbr.rel (%p1276_p7) target bundleno = 467 (0x1d3), region = 32  ;;  %s1109_s15 = sshll.u32 (!%p1276_p7), %s1106_s25, 2 }
  0x50   : > { %s250_s10 = scalar_lea.sflag (!%p1276_p7), [#allocation3], %s1106_s25  ;;  %s253_s16 = scalar_lea.vmem (!%p1276_p7), [#allocation2], %s1109_s15 }
  0x56   : > { %879 = dma.done.wait (%p1277_p3), %s250_s10, 64  }
  0x57   : > { %881 = vsyncadd (%p1277_p3), %s250_s10, 4294967232  ;;  %p1278_p13 = scmp.eq.s32.totalorder %s990_s24, 0 }
  0x59   : > { %883 = dma.done.wait (%p1278_p13), [#allocation6], 256   ;;  %p1279_p4 = pmov %p1278_p13 }
  0x5a   : > { %v922_v0 = vmov 0.0   ;;  %vm923_vm0 = vmmov 0   ;;  %v710_v1 = vld [vmem:[#allocation5] sm:$0xff]   ;;  %v711_v2 = vld [vmem:[#allocation5 + $0x8] sm:$0xff]   ;;  %v295_v3 = vld [vmem:[%s253_s16] sm:$0xf] }
  0x5b   : > { %885 = vsyncadd (%p1279_p4), [#allocation6], 4294967040  ;;  %613 = vmatprep.subr.bf16.mxu0 %v922_v0  ;;  %617 = vmatprep.mubr.msk.bf16.mxu0 %vm923_vm0, %v922_v0  ;;  %vm319_vm1 = vcmask 261120   ;;  %v596_v4 = vld [vmem:[%s1260_s2] ss:$0 sm:$0xff]  ;;  %s1125_s17 = sshll.u32 %s908_s21, 6 }
  0x5c   : > { %614 = vmatpush3.bf16.msra.mxu0 %v710_v1  ;;  %s279_s8 = scalar_lea.vmem [#allocation7], %s1109_s15  ;;  %vm364_vm2 = vcmask 257024   ;;  %s1132_s29 = scalar_lea.hbm %s1261_s3, %s1125_s17 }
  0x5d   : > { %615 = vmatprep.subr.bf16.mxu0 %v922_v0  ;;  %s402_s6 = sshll.u32 %s279_s8, 4  ;;  %s924_s21 = smov 96   ;;  %s1134_s6 = int_to_ptr.vmem [resolvable:$true] %s402_s6 }
  0x5e   : > { %s378_s12 = scalar_lea.sflag [#allocation4], %s1106_s25  ;;  %s770_s14 = scalar_lea.vmem %s1134_s6, 64 }
  0x5f   : > { %p771_p6 = scmp.ne.s32.totalorder %s1134_s6, %s770_s14  ;;  %s925_s10 = smov [#allocation7]  }
  0x60   : > { %616 = vmatpush3.bf16.msra.mxu0 %v711_v2  ;;  %s774_s16 = sshll.u32 %s925_s10, 4  ;;  %s775_s16 = int_to_ptr.vmem [resolvable:$false] %s774_s16 }
  0x61   : > { %p772_p8 = pnand %p771_p6, %p1053_p10  ;;  %s776_s26 = scalar_lea.vmem %s775_s16, 128 }
  0x62   : > { %p777_p11 = scmp.lt.s32.totalorder %s1134_s6, %s775_s16  ;;  %p778_p0 = scmp.lt.s32.totalorder %s776_s26, %s770_s14 }
  0x63   : > { %618 = vmatmul.mubr.msk.bf16.vlgmr.msra.gmra.mrb[0].mxu0 %vm319_vm1, %v295_v3  ;;  %p773_p12 = pneg %p772_p8 }
  0x64   : > { %p779_p5 = por %p778_p0, %p777_p11 }
  0x66   : > { %p780_p9 = pnand %p779_p5, %p773_p12 }
 0x136   : > { %v357_v5 = vpop.f32.mrb[0].mxu0 }
 0x137   : > { %v358_v6 = vadd.f32 %v596_v4, %v357_v5  ;;  %v619_v7 = vpop.f32.mrb[1].mxu0 }
 0x138   : > { %v360_v8 = vpop.f32.mrb[2].mxu0 }
 0x139   : > { %v363_v9 = vpack.c.bf16 %v358_v6, %v358_v6  ;;  %v620_v10 = vpop.f32.mrb[3].mxu0 }
 0x13b   : > { %369 = vrot.lane.b32.xlu0 %v363_v9, %s924_s21  ;;  %365 = vst.msk [vmem:[%s279_s8] sm:$0xf] %vm364_vm2, %v363_v9 }
 0x13c   : > { %783 = shalt.err (!%p780_p9)
}
 0x13d   : > { %s784_s25 = scalar_lea.hbm %s1132_s29, 64  ;;  %s788_s9 = scalar_lea.hbm %s1261_s3, 128 }
 0x13e   : > { %p785_p1 = scmp.ne.s32.totalorder %s1132_s29, %s784_s25  ;;  %p789_p3 = scmp.lt.u32.totalorder %s1132_s29, %s1261_s3 }
 0x13f   : > { %p790_p13 = scmp.lt.u32.totalorder %s788_s9, %s784_s25  ;;  %p792_p6 = scmp.lt.u32.totalorder %s784_s25, %s1132_s29 }
 0x140   : > { %p786_p2 = pnand %p785_p1, %p1053_p10 }
 0x141   : > { %p791_p4 = por %p790_p13, %p789_p3 }
 0x142   : > { %p787_p7 = pneg %p786_p2 }
 0x143   : > { %p793_p8 = por %p792_p6, %p791_p4 }
 0x145   : > { %p794_p12 = pnand %p793_p8, %p787_p7 }
 0x147   : > { %797 = shalt.err (!%p794_p12)
}
 0x148   : > { %627 = dma.vmem_to_hbm [thread:$0]  (%p1053_p10), %s1134_s6, 64, %s1132_s29, %s378_s12  }
 0x149   : > { %s926_s14 = smov 64   ;;  %s382_s10 = sand.u32 1, %s990_s24  }
 0x14a   : > { %373 = vrot.lane.b32.xlu0 %v363_v9, %s926_s14  ;;  %s286_s16 = scalar_lea.vmem [#allocation8], %s1109_s15  ;;  %s1165_s8 = scalar_lea.hbm %s1262_s4, %s1125_s17 }
 0x14b   : > { %s416_s26 = sshll.u32 %s286_s16, 4  ;;  %s293_s9 = scalar_lea.vmem [#allocation10], %s1109_s15  ;;  %s1167_s26 = int_to_ptr.vmem [resolvable:$true] %s416_s26 }
 0x14c   : > { %s1172_s30 = sshll.u32 %s293_s9, 4  ;;  %s1175_s24 = scalar_lea.sflag [#allocation9], %s382_s10  ;;  %s1206_s30 = int_to_ptr.vmem [resolvable:$true] %s1172_s30 }
 0x14d   : > { %s798_s6 = scalar_lea.vmem %s1167_s26, 64  ;;  %s927_s29 = smov [#allocation8]  }
 0x14e   : > { %p799_p11 = scmp.ne.s32.totalorder %s1167_s26, %s798_s6  ;;  %s802_s12 = sshll.u32 %s927_s29, 4  ;;  %s803_s12 = int_to_ptr.vmem [resolvable:$false] %s802_s12 }
 0x14f   : > { %s804_s21 = scalar_lea.vmem %s803_s12, 128  ;;  %p805_p9 = scmp.lt.s32.totalorder %s1167_s26, %s803_s12 }
 0x150   : > { %p800_p0 = pnand %p799_p11, %p1053_p10  ;;  %p806_p1 = scmp.lt.s32.totalorder %s804_s21, %s798_s6 }
 0x152   : > { %p801_p5 = pneg %p800_p0  ;;  %p807_p2 = por %p806_p1, %p805_p9 }
 0x154   : > { %p808_p7 = pnand %p807_p2, %p801_p5 }
 0x1ad   : > { %v370_v11 = vpop.permute.xlu0 %369 }
 0x1ae   : > { %372 = vst.msk [vmem:[%s286_s16] sm:$0xf] %vm364_vm2, %v370_v11 }
 0x1af   : > { %811 = shalt.err (!%p808_p7)
}
 0x1b0   : > { %s812_s14 = scalar_lea.hbm %s1165_s8, 64  ;;  %s816_s25 = scalar_lea.hbm %s1262_s4, 128 }
 0x1b1   : > { %p813_p3 = scmp.ne.s32.totalorder %s1165_s8, %s812_s14  ;;  %p817_p6 = scmp.lt.u32.totalorder %s1165_s8, %s1262_s4 }
 0x1b2   : > { %p818_p8 = scmp.lt.u32.totalorder %s816_s25, %s812_s14  ;;  %p820_p11 = scmp.lt.u32.totalorder %s812_s14, %s1165_s8 }
 0x1b3   : > { %p814_p13 = pnand %p813_p3, %p1053_p10 }
 0x1b4   : > { %p819_p12 = por %p818_p8, %p817_p6 }
 0x1b5   : > { %p815_p4 = pneg %p814_p13 }
 0x1b6   : > { %p821_p0 = por %p820_p11, %p819_p12 }
 0x1b8   : > { %p822_p5 = pnand %p821_p0, %p815_p4 }
 0x1ba   : > { %825 = shalt.err (!%p822_p5)
}
 0x1bb   : > { %628 = dma.vmem_to_hbm [thread:$0]  (%p1053_p10), %s1167_s26, 64, %s1165_s8, %s1175_s24  }
 0x1bc   : > { %s1203_s21 = scalar_lea.hbm %s1263_s5, %s1125_s17  ;;  %v374_v12 = vpop.permute.xlu0 %373  ;;  %s826_s14 = scalar_lea.vmem %s1206_s30, 64 }
 0x1bd   : > { %376 = vst.msk [vmem:[%s293_s9] sm:$0xf] %vm364_vm2, %v374_v12  ;;  %p827_p9 = scmp.ne.s32.totalorder %s1206_s30, %s826_s14  ;;  %s928_s26 = smov [#allocation10]  }
 0x1be   : > { %s830_s8 = sshll.u32 %s928_s26, 4  ;;  %s831_s8 = int_to_ptr.vmem [resolvable:$false] %s830_s8 }
 0x1bf   : > { %p828_p1 = pnand %p827_p9, %p1053_p10  ;;  %s832_s10 = scalar_lea.vmem %s831_s8, 128 }
 0x1c0   : > { %p833_p7 = scmp.lt.s32.totalorder %s1206_s30, %s831_s8  ;;  %p834_p3 = scmp.lt.s32.totalorder %s832_s10, %s826_s14 }
 0x1c1   : > { %p829_p2 = pneg %p828_p1 }
 0x1c2   : > { %p835_p13 = por %p834_p3, %p833_p7 }
 0x1c4   : > { %p836_p4 = pnand %p835_p13, %p829_p2 }
 0x1c6   : > { %839 = shalt.err (!%p836_p4)
}
 0x1c7   : > { %s840_s15 = scalar_lea.hbm %s1203_s21, 64  ;;  %s844_s16 = scalar_lea.hbm %s1263_s5, 128 }
 0x1c8   : > { %p841_p6 = scmp.ne.s32.totalorder %s1203_s21, %s840_s15  ;;  %p845_p11 = scmp.lt.u32.totalorder %s1203_s21, %s1263_s5 }
 0x1c9   : > { %p846_p0 = scmp.lt.u32.totalorder %s844_s16, %s840_s15  ;;  %p848_p9 = scmp.lt.u32.totalorder %s840_s15, %s1203_s21 }
 0x1ca   : > { %p842_p8 = pnand %p841_p6, %p1053_p10 }
 0x1cb   : > { %p847_p5 = por %p846_p0, %p845_p11 }
 0x1cc   : > { %p843_p12 = pneg %p842_p8 }
 0x1cd   : > { %p849_p1 = por %p848_p9, %p847_p5 }
 0x1cf   : > { %p850_p2 = pnand %p849_p1, %p843_p12 }
 0x1d1   : > { %853 = shalt.err (!%p850_p2)
}
 0x1d2   : > { %629 = dma.vmem_to_hbm [thread:$0]  (%p1053_p10), %s1206_s30, 64, %s1203_s21, %s1175_s24  }
 0x1d3 PF: > { %s442_s29 = sand.u32 1, %s896_s18   ;;  %p1280_p7 = scmp.ne.s32.totalorder %s1269_s27, 0 }
 0x1d4   : > { %p1281_p3 = scmp.ge.s32.totalorder %s916_s23, 2  ;;  %s443_s6 = scalar_lea.sflag [#allocation4], %s442_s29 }
 0x1d6   : > { %p642_p13 = pnand %p1281_p3, %p1280_p7 }
 0x1d8   : > { %887 = dma.done.wait (!%p642_p13), %s443_s6, 64  }
 0x1d9   : > { %889 = vsyncadd (!%p642_p13), %s443_s6, 4294967232  ;;  %s1282_s12 = sadd.s32 4294967294, %s916_s23  }
 0x1da   : > { %s451_s14 = sand.u32 1, %s1282_s12  }
 0x1db   : > { %s452_s26 = scalar_lea.sflag [#allocation9], %s451_s14 }
 0x1dc   : > { %891 = dma.done.wait (!%p642_p13), %s452_s26, 128  }
 0x1dd   : > { %893 = vsyncadd (!%p642_p13), %s452_s26, 4294967168  ;;  %s26_s23 = sadd.s32 1, %s916_s23   ;;  %s1283_s18 = smov %s900_s19 }
 0x1de   : > { %p23_p10 = scmp.ge.s32.totalorder %s26_s23, 4   ;;  %s1284_s19 = smov %s904_s20 }
 0x1df   : > { %s1285_s20 = smov %s1062_s13  ;;  %s1286_s21 = smov %s912_s22 }
 0x1e0   : > { %s1287_s22 = smov %s1289_s7  ;;  %25 = sbr.rel (!%p23_p10) target bundleno = 9 (0x9), region = 113 }
 0x1e7   :  { %466 = vsyncpa [#allocation3], 1 }
 0x1e8   :  { %468 = vsyncpa [#allocation3 + $0x1], 1 }
 0x1e9   :  { %469 = vsyncpa [#allocation6], 1 }
 0x1ea   :  { %470 = vsyncpa [#allocation4], 1 }
 0x1eb   :  { %472 = vsyncpa [#allocation4 + $0x1], 1 }
 0x1ec   :  { %473 = vsyncpa [#allocation9], 1 }
 0x1ed   :  { %475 = vsyncpa [#allocation9 + $0x1], 1 }

// kernel: tpu_custom_call.1
= control target key start
LH: loop header
LB: loop body
LE: loop exit
PB: predicated region body
PF: predicated region fallthrough
CT: control target
= control target key end

     0   :  { %11 = vsyncpa [#allocation3], 0  ;;  %s1258_s0 = inlined_call_operand.hbm [shape: bf16[2,8,32], index: 0, kind: input, shape index: {}]   ;;  %s1259_s1 = inlined_call_operand.hbm [shape: bf16[32,96], index: 1, kind: input, shape index: {}]   ;;  %s1260_s2 = inlined_call_operand.vmem [shape: f32[1,96], index: 2, kind: input, shape index: {}]   ;;  %s1261_s3 = inlined_call_operand.hbm [shape: bf16[2,8,32], index: 3, kind: output, shape index: {0}]   ;;  %s1262_s4 = inlined_call_operand.hbm [shape: bf16[2,8,32], index: 4, kind: output, shape index: {1}]   ;;  %s1263_s5 = inlined_call_operand.hbm [shape: bf16[2,8,32], index: 5, kind: output, shape index: {2}]  }
   0x1   :  { %13 = vsyncpa [#allocation3 + $0x1], 0 }
   0x2   :  { %14 = vsyncpa [#allocation6], 0 }
   0x3   :  { %15 = vsyncpa [#allocation4], 0 }
   0x4   :  { %17 = vsyncpa [#allocation4 + $0x1], 0 }
   0x5   :  { %18 = vsyncpa [#allocation9], 0 }
   0x6   :  { %20 = vsyncpa [#allocation9 + $0x1], 0  ;;  %s959_s18 = smov 0   ;;  %s961_s19 = smov 0  }
   0x7   :  { %s963_s20 = smov 0   ;;  %s965_s21 = smov 0  }
   0x8   :  { %s967_s22 = smov 0   ;;  %s969_s23 = smov 0  }
   0x9 LB: > { %s990_s24 = sadd.s32 4294967295, %s916_s23   ;;  %s1267_s25 = sadd.s32 4294967294, %s916_s23   ;;  %s916_s23 = sphi %s969_s23, %s26_s23   ;;  %s912_s22 = sphi %s967_s22, %s1287_s22   ;;  %s908_s21 = sphi %s965_s21, %s1286_s21   ;;  %s904_s20 = sphi %s963_s20, %s1285_s20   ;;  %s900_s19 = sphi %s961_s19, %s1284_s19   ;;  %s896_s18 = sphi %s959_s18, %s1283_s18  }
   0xa   : > { %p60_p0 = scmp.ne.s32.totalorder %s900_s19, %s896_s18  ;;  %p1264_p1 = scmp.eq.s32.totalorder %s990_s24, 0 }
   0xb   : > { %p134_p3 = scmp.eq.s32.totalorder %s1267_s25, 1  ;;  %p585_p5 = scmp.ge.s32.totalorder %s916_s23, 1 }
   0xc   : > { %p1001_p4 = por %p1264_p1, %p60_p0  ;;  %p197_p7 = scmp.lt.s32.totalorder %s916_s23, 3 }
   0xd   : > { %p1006_p6 = por %p134_p3, %p60_p0  ;;  %s918_s29 = smov [#allocation5]  }
   0xe   : > { %s1268_s26 = scalar_select %p1001_p4, 1, 0 }
   0xf   : > { %s1269_s27 = scalar_select %p1006_p6, 1, 0 }
  0x10   : > { %p1011_p8 = pnand %p585_p5, %p197_p7  ;;  %s209_s30 = sshll.u32 %s918_s29, 4  ;;  %s210_s30 = int_to_ptr.vmem [resolvable:$true] %s209_s30 }
  0x11   : > { %s38_s7 = sadd.s32 1, %s912_s22  ;;  %s712_s10 = scalar_lea.hbm %s1259_s1, 256 }
  0x12   : > { %s1270_s28 = scalar_select %p1011_p8, 1, 0 }
  0x13   : > { %p633_p9 = pneg %p1011_p8  ;;  %p713_p12 = scmp.ne.s32.totalorder %s1259_s1, %s712_s10 }
  0x14   : > { %p719_p5 = scmp.lt.u32.totalorder %s712_s10, %s1259_s1 }
  0x15   : > { %p1020_p11 = pnand %p633_p9, %p1264_p1 }
  0x17   : > { %p714_p13 = pneg %p1020_p11 }
  0x19   : > { %p715_p0 = pnand %p714_p13, %p713_p12 }
  0x1b   : > { %p716_p3 = pneg %p715_p0 }
  0x1d   : > { %p721_p7 = pnand %p719_p5, %p716_p3 }
  0x1f   : > { %724 = shalt.err (!%p721_p7)
}
  0x20   : > { %s725_s15 = scalar_lea.vmem %s210_s30, 256  ;;  %p733_p2 = scmp.lt.s32.totalorder %s210_s30, %s210_s30 }
  0x21   : > { %p726_p9 = scmp.ne.s32.totalorder %s210_s30, %s725_s15  ;;  %p734_p6 = scmp.lt.s32.totalorder %s725_s15, %s725_s15 }
  0x23   : > { %p728_p10 = pnand %p726_p9, %p714_p13  ;;  %p735_p4 = por %p734_p6, %p733_p2 }
  0x25   : > { %p729_p1 = pneg %p728_p10 }
  0x27   : > { %p736_p8 = pnand %p735_p4, %p729_p1 }
  0x29   : > { %739 = shalt.err (!%p736_p8)
}
  0x2a   : > { %s919_s16 = smov 64   ;;  %s920_s17 = smov 4  }
  0x2b   : > { %636 = dma.hbm_to_vmem [thread:$0]  (!%p1020_p11), %s1259_s1, 256, %s210_s30, [#allocation6], %s919_s16, %s919_s16, %s920_s17  }
  0x2c   : > { %p40_p1 = scmp.ge.s32.totalorder %s38_s7, 2  ;;  %s47_s9 = sadd.s32 1, %s904_s20 }
  0x2d   : > { %p54_p2 = scmp.ne.s32.totalorder %s904_s20, %s900_s19  ;;  %p55_p4 = scmp.eq.s32.totalorder %s916_s23, 0 }
  0x2e   : > { %s1289_s7 = smov (%p40_p1, %s38_s7), 0  ;;  %p1273_p8 = scmp.eq.s32.totalorder %s990_s24, 1 }
  0x2f   : > { %p1047_p6 = por %p55_p4, %p54_p2  ;;  %s42_s6 = ssub.s32 %s912_s22, %s1289_s7 }
  0x30   : > { %p1053_p10 = por %p1273_p8, %p54_p2  ;;  %p652_p12 = scmp.lt.s32.totalorder %s916_s23, 2 }
  0x31   : > { %p45_p11 = scmp.eq.s32.totalorder %s42_s6, 0  ;;  %s226_s30 = sand.u32 1, %s904_s20  }
  0x32   : > { %s588_s12 = sshll.u32 %s226_s30, 2  ;;  %s589_s14 = sshll.u32 %s912_s22, 6 }
  0x33   : > { %s1062_s13 = scalar_select %p45_p11, %s904_s20, %s47_s9  }
  0x34   : > { %s1068_s17 = scalar_lea.hbm %s1258_s0, %s589_s14  ;;  %s230_s29 = scalar_lea.vmem [#allocation2], %s588_s12 }
  0x35   : > { %s238_s8 = sshll.u32 %s230_s29, 4  ;;  %p1074_p13 = pnand %p652_p12, %p1047_p6  ;;  %s1070_s8 = int_to_ptr.vmem [resolvable:$true] %s238_s8 }
  0x36   : > { %s227_s9 = scalar_lea.sflag [#allocation3], %s226_s30  ;;  %s740_s25 = scalar_lea.hbm %s1068_s17, 64 }
  0x37   : > { %p741_p0 = scmp.ne.s32.totalorder %s1068_s17, %s740_s25  ;;  %p742_p3 = pneg %p1074_p13 }
  0x38   : > { %s745_s15 = scalar_lea.hbm %s1258_s0, 128  ;;  %p746_p9 = scmp.lt.u32.totalorder %s1068_s17, %s1258_s0 }
  0x39   : > { %p743_p5 = pnand %p742_p3, %p741_p0  ;;  %p747_p1 = scmp.lt.u32.totalorder %s745_s15, %s740_s25 }
  0x3a   : > { %p749_p4 = scmp.lt.u32.totalorder %s740_s25, %s1068_s17 }
  0x3b   : > { %p744_p7 = pneg %p743_p5  ;;  %p748_p2 = por %p747_p1, %p746_p9 }
  0x3d   : > { %p750_p6 = por %p749_p4, %p748_p2 }
  0x3f   : > { %p751_p8 = pnand %p750_p6, %p744_p7 }
  0x41   : > { %754 = shalt.err (!%p751_p8)
}
  0x42   : > { %s755_s30 = scalar_lea.vmem %s1070_s8, 64  ;;  %s921_s29 = smov [#allocation2]  }
  0x43   : > { %p756_p12 = scmp.ne.s32.totalorder %s1070_s8, %s755_s30  ;;  %s760_s12 = sshll.u32 %s921_s29, 4  ;;  %s761_s12 = int_to_ptr.vmem [resolvable:$false] %s760_s12 }
  0x44   : > { %s762_s14 = scalar_lea.vmem %s761_s12, 128  ;;  %p763_p5 = scmp.lt.s32.totalorder %s1070_s8, %s761_s12 }
  0x45   : > { %p758_p11 = pnand %p756_p12, %p742_p3  ;;  %p764_p9 = scmp.lt.s32.totalorder %s762_s14, %s755_s30 }
  0x47   : > { %p759_p0 = pneg %p758_p11  ;;  %p765_p1 = por %p764_p9, %p763_p5 }
  0x49   : > { %p766_p2 = pnand %p765_p1, %p759_p0 }
  0x4b   : > { %769 = shalt.err (!%p766_p2)
}
  0x4c   : > { %640 = dma.hbm_to_vmem [thread:$0]  (!%p1074_p13), %s1068_s17, 64, %s1070_s8, %s227_s9  }
  0x4d   : > { %p1276_p7 = scmp.ne.s32.totalorder %s1270_s28, 0 }
  0x4e   : > { %s1106_s25 = sand.u32 (!%p1276_p7), 1, %s900_s19   ;;  %p1277_p3 = scmp.ne.s32.totalorder (!%p1276_p7), %s1268_s26, 0 }
  0x4f   : > { %247 = sbr.rel (%p1276_p7) target bundleno = 467 (0x1d3), region = 32  ;;  %s1109_s15 = sshll.u32 (!%p1276_p7), %s1106_s25, 2 }
  0x50   : > { %s250_s10 = scalar_lea.sflag (!%p1276_p7), [#allocation3], %s1106_s25  ;;  %s253_s16 = scalar_lea.vmem (!%p1276_p7), [#allocation2], %s1109_s15 }
  0x56   : > { %879 = dma.done.wait (%p1277_p3), %s250_s10, 64  }
  0x57   : > { %881 = vsyncadd (%p1277_p3), %s250_s10, 4294967232  ;;  %p1278_p13 = scmp.eq.s32.totalorder %s990_s24, 0 }
  0x59   : > { %883 = dma.done.wait (%p1278_p13), [#allocation6], 256   ;;  %p1279_p4 = pmov %p1278_p13 }
  0x5a   : > { %v922_v0 = vmov 0.0   ;;  %vm923_vm0 = vmmov 0   ;;  %v710_v1 = vld [vmem:[#allocation5] sm:$0xff]   ;;  %v711_v2 = vld [vmem:[#allocation5 + $0x8] sm:$0xff]   ;;  %v295_v3 = vld [vmem:[%s253_s16] sm:$0xf] }
  0x5b   : > { %885 = vsyncadd (%p1279_p4), [#allocation6], 4294967040  ;;  %613 = vmatprep.subr.bf16.mxu0 %v922_v0  ;;  %617 = vmatprep.mubr.msk.bf16.mxu0 %vm923_vm0, %v922_v0  ;;  %vm319_vm1 = vcmask 261120   ;;  %v596_v4 = vld [vmem:[%s1260_s2] ss:$0 sm:$0xff]  ;;  %s1125_s17 = sshll.u32 %s908_s21, 6 }
  0x5c   : > { %614 = vmatpush3.bf16.msra.mxu0 %v710_v1  ;;  %s279_s8 = scalar_lea.vmem [#allocation7], %s1109_s15  ;;  %vm364_vm2 = vcmask 257024   ;;  %s1132_s29 = scalar_lea.hbm %s1261_s3, %s1125_s17 }
  0x5d   : > { %615 = vmatprep.subr.bf16.mxu0 %v922_v0  ;;  %s402_s6 = sshll.u32 %s279_s8, 4  ;;  %s924_s21 = smov 96   ;;  %s1134_s6 = int_to_ptr.vmem [resolvable:$true] %s402_s6 }
  0x5e   : > { %s378_s12 = scalar_lea.sflag [#allocation4], %s1106_s25  ;;  %s770_s14 = scalar_lea.vmem %s1134_s6, 64 }
  0x5f   : > { %p771_p6 = scmp.ne.s32.totalorder %s1134_s6, %s770_s14  ;;  %s925_s10 = smov [#allocation7]  }
  0x60   : > { %616 = vmatpush3.bf16.msra.mxu0 %v711_v2  ;;  %s774_s16 = sshll.u32 %s925_s10, 4  ;;  %s775_s16 = int_to_ptr.vmem [resolvable:$false] %s774_s16 }
  0x61   : > { %p772_p8 = pnand %p771_p6, %p1053_p10  ;;  %s776_s26 = scalar_lea.vmem %s775_s16, 128 }
  0x62   : > { %p777_p11 = scmp.lt.s32.totalorder %s1134_s6, %s775_s16  ;;  %p778_p0 = scmp.lt.s32.totalorder %s776_s26, %s770_s14 }
  0x63   : > { %618 = vmatmul.mubr.msk.bf16.vlgmr.msra.gmra.mrb[0].mxu0 %vm319_vm1, %v295_v3  ;;  %p773_p12 = pneg %p772_p8 }
  0x64   : > { %p779_p5 = por %p778_p0, %p777_p11 }
  0x66   : > { %p780_p9 = pnand %p779_p5, %p773_p12 }
 0x136   : > { %v357_v5 = vpop.f32.mrb[0].mxu0 }
 0x137   : > { %v358_v6 = vadd.f32 %v596_v4, %v357_v5  ;;  %v619_v7 = vpop.f32.mrb[1].mxu0 }
 0x138   : > { %v360_v8 = vpop.f32.mrb[2].mxu0 }
 0x139   : > { %v363_v9 = vpack.c.bf16 %v358_v6, %v358_v6  ;;  %v620_v10 = vpop.f32.mrb[3].mxu0 }
 0x13b   : > { %369 = vrot.lane.b32.xlu0 %v363_v9, %s924_s21  ;;  %365 = vst.msk [vmem:[%s279_s8] sm:$0xf] %vm364_vm2, %v363_v9 }
 0x13c   : > { %783 = shalt.err (!%p780_p9)
}
 0x13d   : > { %s784_s25 = scalar_lea.hbm %s1132_s29, 64  ;;  %s788_s9 = scalar_lea.hbm %s1261_s3, 128 }
 0x13e   : > { %p785_p1 = scmp.ne.s32.totalorder %s1132_s29, %s784_s25  ;;  %p789_p3 = scmp.lt.u32.totalorder %s1132_s29, %s1261_s3 }
 0x13f   : > { %p790_p13 = scmp.lt.u32.totalorder %s788_s9, %s784_s25  ;;  %p792_p6 = scmp.lt.u32.totalorder %s784_s25, %s1132_s29 }
 0x140   : > { %p786_p2 = pnand %p785_p1, %p1053_p10 }
 0x141   : > { %p791_p4 = por %p790_p13, %p789_p3 }
 0x142   : > { %p787_p7 = pneg %p786_p2 }
 0x143   : > { %p793_p8 = por %p792_p6, %p791_p4 }
 0x145   : > { %p794_p12 = pnand %p793_p8, %p787_p7 }
 0x147   : > { %797 = shalt.err (!%p794_p12)
}
 0x148   : > { %627 = dma.vmem_to_hbm [thread:$0]  (%p1053_p10), %s1134_s6, 64, %s1132_s29, %s378_s12  }
 0x149   : > { %s926_s14 = smov 64   ;;  %s382_s10 = sand.u32 1, %s990_s24  }
 0x14a   : > { %373 = vrot.lane.b32.xlu0 %v363_v9, %s926_s14  ;;  %s286_s16 = scalar_lea.vmem [#allocation8], %s1109_s15  ;;  %s1165_s8 = scalar_lea.hbm %s1262_s4, %s1125_s17 }
 0x14b   : > { %s416_s26 = sshll.u32 %s286_s16, 4  ;;  %s293_s9 = scalar_lea.vmem [#allocation10], %s1109_s15  ;;  %s1167_s26 = int_to_ptr.vmem [resolvable:$true] %s416_s26 }
 0x14c   : > { %s1172_s30 = sshll.u32 %s293_s9, 4  ;;  %s1175_s24 = scalar_lea.sflag [#allocation9], %s382_s10  ;;  %s1206_s30 = int_to_ptr.vmem [resolvable:$true] %s1172_s30 }
 0x14d   : > { %s798_s6 = scalar_lea.vmem %s1167_s26, 64  ;;  %s927_s29 = smov [#allocation8]  }
 0x14e   : > { %p799_p11 = scmp.ne.s32.totalorder %s1167_s26, %s798_s6  ;;  %s802_s12 = sshll.u32 %s927_s29, 4  ;;  %s803_s12 = int_to_ptr.vmem [resolvable:$false] %s802_s12 }
 0x14f   : > { %s804_s21 = scalar_lea.vmem %s803_s12, 128  ;;  %p805_p9 = scmp.lt.s32.totalorder %s1167_s26, %s803_s12 }
 0x150   : > { %p800_p0 = pnand %p799_p11, %p1053_p10  ;;  %p806_p1 = scmp.lt.s32.totalorder %s804_s21, %s798_s6 }
 0x152   : > { %p801_p5 = pneg %p800_p0  ;;  %p807_p2 = por %p806_p1, %p805_p9 }
 0x154   : > { %p808_p7 = pnand %p807_p2, %p801_p5 }
 0x1ad   : > { %v370_v11 = vpop.permute.xlu0 %369 }
 0x1ae   : > { %372 = vst.msk [vmem:[%s286_s16] sm:$0xf] %vm364_vm2, %v370_v11 }
 0x1af   : > { %811 = shalt.err (!%p808_p7)
}
 0x1b0   : > { %s812_s14 = scalar_lea.hbm %s1165_s8, 64  ;;  %s816_s25 = scalar_lea.hbm %s1262_s4, 128 }
 0x1b1   : > { %p813_p3 = scmp.ne.s32.totalorder %s1165_s8, %s812_s14  ;;  %p817_p6 = scmp.lt.u32.totalorder %s1165_s8, %s1262_s4 }
 0x1b2   : > { %p818_p8 = scmp.lt.u32.totalorder %s816_s25, %s812_s14  ;;  %p820_p11 = scmp.lt.u32.totalorder %s812_s14, %s1165_s8 }
 0x1b3   : > { %p814_p13 = pnand %p813_p3, %p1053_p10 }
 0x1b4   : > { %p819_p12 = por %p818_p8, %p817_p6 }
 0x1b5   : > { %p815_p4 = pneg %p814_p13 }
 0x1b6   : > { %p821_p0 = por %p820_p11, %p819_p12 }
 0x1b8   : > { %p822_p5 = pnand %p821_p0, %p815_p4 }
 0x1ba   : > { %825 = shalt.err (!%p822_p5)
}
 0x1bb   : > { %628 = dma.vmem_to_hbm [thread:$0]  (%p1053_p10), %s1167_s26, 64, %s1165_s8, %s1175_s24  }
 0x1bc   : > { %s1203_s21 = scalar_lea.hbm %s1263_s5, %s1125_s17  ;;  %v374_v12 = vpop.permute.xlu0 %373  ;;  %s826_s14 = scalar_lea.vmem %s1206_s30, 64 }
 0x1bd   : > { %376 = vst.msk [vmem:[%s293_s9] sm:$0xf] %vm364_vm2, %v374_v12  ;;  %p827_p9 = scmp.ne.s32.totalorder %s1206_s30, %s826_s14  ;;  %s928_s26 = smov [#allocation10]  }
 0x1be   : > { %s830_s8 = sshll.u32 %s928_s26, 4  ;;  %s831_s8 = int_to_ptr.vmem [resolvable:$false] %s830_s8 }
 0x1bf   : > { %p828_p1 = pnand %p827_p9, %p1053_p10  ;;  %s832_s10 = scalar_lea.vmem %s831_s8, 128 }
 0x1c0   : > { %p833_p7 = scmp.lt.s32.totalorder %s1206_s30, %s831_s8  ;;  %p834_p3 = scmp.lt.s32.totalorder %s832_s10, %s826_s14 }
 0x1c1   : > { %p829_p2 = pneg %p828_p1 }
 0x1c2   : > { %p835_p13 = por %p834_p3, %p833_p7 }
 0x1c4   : > { %p836_p4 = pnand %p835_p13, %p829_p2 }
 0x1c6   : > { %839 = shalt.err (!%p836_p4)
}
 0x1c7   : > { %s840_s15 = scalar_lea.hbm %s1203_s21, 64  ;;  %s844_s16 = scalar_lea.hbm %s1263_s5, 128 }
 0x1c8   : > { %p841_p6 = scmp.ne.s32.totalorder %s1203_s21, %s840_s15  ;;  %p845_p11 = scmp.lt.u32.totalorder %s1203_s21, %s1263_s5 }
 0x1c9   : > { %p846_p0 = scmp.lt.u32.totalorder %s844_s16, %s840_s15  ;;  %p848_p9 = scmp.lt.u32.totalorder %s840_s15, %s1203_s21 }
 0x1ca   : > { %p842_p8 = pnand %p841_p6, %p1053_p10 }
 0x1cb   : > { %p847_p5 = por %p846_p0, %p845_p11 }
 0x1cc   : > { %p843_p12 = pneg %p842_p8 }
 0x1cd   : > { %p849_p1 = por %p848_p9, %p847_p5 }
 0x1cf   : > { %p850_p2 = pnand %p849_p1, %p843_p12 }
 0x1d1   : > { %853 = shalt.err (!%p850_p2)
}
 0x1d2   : > { %629 = dma.vmem_to_hbm [thread:$0]  (%p1053_p10), %s1206_s30, 64, %s1203_s21, %s1175_s24  }
 0x1d3 PF: > { %s442_s29 = sand.u32 1, %s896_s18   ;;  %p1280_p7 = scmp.ne.s32.totalorder %s1269_s27, 0 }
 0x1d4   : > { %p1281_p3 = scmp.ge.s32.totalorder %s916_s23, 2  ;;  %s443_s6 = scalar_lea.sflag [#allocation4], %s442_s29 }
 0x1d6   : > { %p642_p13 = pnand %p1281_p3, %p1280_p7 }
 0x1d8   : > { %887 = dma.done.wait (!%p642_p13), %s443_s6, 64  }
 0x1d9   : > { %889 = vsyncadd (!%p642_p13), %s443_s6, 4294967232  ;;  %s1282_s12 = sadd.s32 4294967294, %s916_s23  }
 0x1da   : > { %s451_s14 = sand.u32 1, %s1282_s12  }
 0x1db   : > { %s452_s26 = scalar_lea.sflag [#allocation9], %s451_s14 }
 0x1dc   : > { %891 = dma.done.wait (!%p642_p13), %s452_s26, 128  }
 0x1dd   : > { %893 = vsyncadd (!%p642_p13), %s452_s26, 4294967168  ;;  %s26_s23 = sadd.s32 1, %s916_s23   ;;  %s1283_s18 = smov %s900_s19 }
 0x1de   : > { %p23_p10 = scmp.ge.s32.totalorder %s26_s23, 4   ;;  %s1284_s19 = smov %s904_s20 }
 0x1df   : > { %s1285_s20 = smov %s1062_s13  ;;  %s1286_s21 = smov %s912_s22 }
 0x1e0   : > { %s1287_s22 = smov %s1289_s7  ;;  %25 = sbr.rel (!%p23_p10) target bundleno = 9 (0x9), region = 113 }
 0x1e7   :  { %466 = vsyncpa [#allocation3], 1 }
 0x1e8   :  { %468 = vsyncpa [#allocation3 + $0x1], 1 }
 0x1e9   :  { %469 = vsyncpa [#allocation6], 1 }
 0x1ea   :  { %470 = vsyncpa [#allocation4], 1 }
 0x1eb   :  { %472 = vsyncpa [#allocation4 + $0x1], 1 }
 0x1ec   :  { %473 = vsyncpa [#allocation9], 1 }
 0x1ed   :  { %475 = vsyncpa [#allocation9 + $0x1], 1 }

</bundles_post_ra>
